<compile_context>
chip_gen: v7x
topology: tpu7x:2x2x1
jax: 0.10.0
libtpu: 0.0.40
codegen_flags: <defaults>
</compile_context>

<pallas_src>
import numpy as np
import jax
import jax.numpy as jnp
from jax import lax
from jax.experimental import pallas as pl
from jax.experimental.pallas import tpu as pltpu

# Problem sizes (implied by the module; spatial size from its test input 28x28).
H, W = 28, 28
KH, KW = 3, 3
DIL = 2
OC = 8
KK = KH * KW                      # 9
OH = H - DIL * (KH - 1)           # 24
OW = W - DIL * (KW - 1)           # 24
OHW = OH * OW                     # 576  (lane-dense last dim, 4.5 vregs wide)


def conv_relu_kernel(p_ref, w_ref, b_ref, o_ref):
    """One batch element: relu(W(8,9) @ patches(9,576) + bias) -> (8,576)."""
    acc = jnp.dot(w_ref[...], p_ref[...], preferred_element_type=jnp.float32)
    o_ref[...] = jnp.maximum(acc + b_ref[...], 0.0)


def _im2col(x_planes):
    """x_planes: (N, H, W) -> (N, KK, OH*OW), tap order kh-major / kw-minor."""
    n = x_planes.shape[0]
    taps = []
    for kh in range(KH):
        for kw in range(KW):
            r0 = kh * DIL
            c0 = kw * DIL
            taps.append(
                x_planes[:, r0:r0 + OH, c0:c0 + OW].reshape(n, 1, OHW))
    return jnp.concatenate(taps, axis=1)                    # (N, 9, 576)


def model_relu_forward(x_nchw, weight_oikk, bias_o):
    """x_nchw: (N, 1, 28, 28) f32; weight: (8, 1, 3, 3) f32; bias: (8,) f32."""
    n = x_nchw.shape[0]
    assert x_nchw.shape == (n, 1, H, W)

    patches = _im2col(x_nchw[:, 0, :, :])                   # (N, 9, 576)
    w_mat = weight_oikk.reshape(OC, KK)                     # (8, 9), matches tap order
    b_col = bias_o.reshape(OC, 1)                           # (8, 1), lane-broadcast

    out = pl.pallas_call(
        conv_relu_kernel,
        out_shape=jax.ShapeDtypeStruct((n, OC, OHW), jnp.float32),
        grid_spec=pltpu.PrefetchScalarGridSpec(
            num_scalar_prefetch=0,
            grid=(n,),
            in_specs=[
                pl.BlockSpec((None, KK, OHW), lambda b: (b, 0, 0)),   # patches
                pl.BlockSpec((OC, KK), lambda b: (0, 0)),             # weights
                pl.BlockSpec((OC, 1), lambda b: (0, 0)),              # bias
            ],
            out_specs=pl.BlockSpec((None, OC, OHW), lambda b: (b, 0, 0)),
        ),
        compiler_params=pltpu.CompilerParams(
            dimension_semantics=("parallel",)),
    )(patches, w_mat, b_col)

    return out.reshape(n, OC, OH, OW)                       # NCHW


def reference_forward(x_nchw, weight_oikk, bias_o):
    """Pure-JAX reference: dilated conv (NCHW) + bias + ReLU."""
    y = lax.conv_general_dilated(
        x_nchw, weight_oikk,
        window_strides=(1, 1),
        padding="VALID",
        rhs_dilation=(DIL, DIL),
        dimension_numbers=("NCHW", "OIHW", "NCHW"),
    )
    y = y + bias_o[None, :, None, None]
    return jnp.maximum(y, 0.0)


if __name__ == "__main__":
    key = jax.random.PRNGKey(0)
    kx, kw, kb = jax.random.split(key, 3)

    # Small batch (N=2) to exercise the parallel batch grid; spatial size from
    # the module's test input (28x28). PyTorch weight layout (OC, IC, KH, KW).
    N = 2
    x1 = jax.random.normal(kx, (N, 1, H, W), dtype=jnp.float32)
    fan_in = 1 * KH * KW
    bound = 1.0 / np.sqrt(fan_in)
    weight = jax.random.uniform(kw, (OC, 1, KH, KW), minval=-bound, maxval=bound,
                                dtype=jnp.float32)
    bias = jax.random.uniform(kb, (OC,), minval=-bound, maxval=bound,
                              dtype=jnp.float32)

    out = model_relu_forward(x1, weight, bias)
    out = jax.block_until_ready(out)

    ref = jax.block_until_ready(reference_forward(x1, weight, bias))
    np.testing.assert_allclose(np.asarray(out), np.asarray(ref), atol=1e-5, rtol=1e-5)
    assert out.shape == (N, OC, OH, OW)

    print("KERNEL_OK")
</pallas_src>

<mosaic_0001>
module attributes {stable_mosaic.version = 11 : i64} {
  func.func @conv_relu_kernel(%arg0: i32, %arg1: memref<1x9x576xf32, #tpu.memory_space<vmem>>, %arg2: memref<8x9xf32, #tpu.memory_space<vmem>>, %arg3: memref<8x1xf32, #tpu.memory_space<vmem>>, %arg4: memref<1x8x576xf32, #tpu.memory_space<vmem>>) attributes {dimension_semantics = [#tpu.dimension_semantics<parallel>], iteration_bounds = array<i64: 2>, scalar_prefetch = 0 : i64, scratch_operands = 0 : i64, tpu.core_type = #tpu.core_type<tc>, window_params = [{transform_indices = @transform_0, window_bounds = array<i64: 1, 9, 576>}, {pipeline_mode = #tpu.pipeline_mode<synchronous>, transform_indices = @transform_1, window_bounds = array<i64: 8, 9>}, {pipeline_mode = #tpu.pipeline_mode<synchronous>, transform_indices = @transform_2, window_bounds = array<i64: 8, 1>}, {transform_indices = @transform_3, window_bounds = array<i64: 1, 8, 576>}]} {
    %c0 = arith.constant 0 : index
    %c0_0 = arith.constant 0 : index
    %0 = vector.load %arg2[%c0, %c0_0] : memref<8x9xf32, #tpu.memory_space<vmem>>, vector<8x9xf32>
    %c0_1 = arith.constant 0 : index
    %c0_2 = arith.constant 0 : index
    %c0_3 = arith.constant 0 : index
    %1 = vector.load %arg1[%c0_1, %c0_2, %c0_3] : memref<1x9x576xf32, #tpu.memory_space<vmem>>, vector<1x9x576xf32>
    %2 = vector.shape_cast %1 : vector<1x9x576xf32> to vector<9x576xf32>
    %cst = arith.constant dense<0.000000e+00> : vector<8x576xf32>
    %3 = tpu.matmul %0, %2, %cst {dimension_numbers = #tpu.dot_dimension_numbers<[1], [0], [0], [1], [0, 0, 1, 1], [], []>} : vector<8x9xf32>, vector<9x576xf32>, vector<8x576xf32> -> vector<8x576xf32>
    %c0_4 = arith.constant 0 : index
    %c0_5 = arith.constant 0 : index
    %4 = vector.load %arg3[%c0_4, %c0_5] : memref<8x1xf32, #tpu.memory_space<vmem>>, vector<8x1xf32>
    %5 = vector.broadcast %4 : vector<8x1xf32> to vector<8x576xf32>
    %6 = arith.addf %3, %5 : vector<8x576xf32>
    %cst_6 = arith.constant 0.000000e+00 : f32
    %7 = vector.broadcast %cst_6 : f32 to vector<8x576xf32>
    %8 = arith.maximumf %6, %7 : vector<8x576xf32>
    %c0_7 = arith.constant 0 : index
    %c0_8 = arith.constant 0 : index
    %c0_9 = arith.constant 0 : index
    %9 = vector.load %arg4[%c0_7, %c0_8, %c0_9] : memref<1x8x576xf32, #tpu.memory_space<vmem>>, vector<1x8x576xf32>
    %10 = vector.shape_cast %9 : vector<1x8x576xf32> to vector<8x576xf32>
    %11 = vector.shape_cast %8 : vector<8x576xf32> to vector<1x8x576xf32>
    tpu.vector_store %arg4[%c0_7, %c0_8, %c0_9], %11 {strides = array<i32>} : memref<1x8x576xf32, #tpu.memory_space<vmem>>, vector<1x8x576xf32>,
    return
  }
  func.func @transform_0(%arg0: i32) -> (i32, i32, i32) {
    %c0_i32 = arith.constant 0 : i32
    %c0_i32_0 = arith.constant 0 : i32
    %c0_i32_1 = arith.constant 0 : i32
    return %arg0, %c0_i32, %c0_i32_0 : i32, i32, i32
  }
  func.func @transform_1(%arg0: i32) -> (i32, i32) {
    %c0_i32 = arith.constant 0 : i32
    %c0_i32_0 = arith.constant 0 : i32
    %c0_i32_1 = arith.constant 0 : i32
    return %c0_i32, %c0_i32_0 : i32, i32
  }
  func.func @transform_2(%arg0: i32) -> (i32, i32) {
    %c0_i32 = arith.constant 0 : i32
    %c0_i32_0 = arith.constant 0 : i32
    %c0_i32_1 = arith.constant 0 : i32
    return %c0_i32, %c0_i32_0 : i32, i32
  }
  func.func @transform_3(%arg0: i32) -> (i32, i32, i32) {
    %c0_i32 = arith.constant 0 : i32
    %c0_i32_0 = arith.constant 0 : i32
    %c0_i32_1 = arith.constant 0 : i32
    return %arg0, %c0_i32, %c0_i32_0 : i32, i32, i32
  }
}

</mosaic_0001>

<bundles_post_ra>
// kernel: tpu_custom_call.1
= control target key start
LH: loop header
LB: loop body
LE: loop exit
PB: predicated region body
PF: predicated region fallthrough
CT: control target
= control target key end

     0   :  { %8 = vsyncpa [#allocation3], 0  ;;  %s807_s0 = inlined_call_operand.vmem [shape: f32[2,9,576], index: 0, kind: input, shape index: {}]   ;;  %s808_s1 = inlined_call_operand.vmem [shape: f32[8,9], index: 1, kind: input, shape index: {}]   ;;  %s809_s2 = inlined_call_operand.vmem [shape: f32[8,1], index: 2, kind: input, shape index: {}]   ;;  %s810_s3 = inlined_call_operand.hbm [shape: f32[2,8,576], index: 3, kind: output, shape index: {}]  }
   0x1   :  { %10 = vsyncpa [#allocation3 + $0x1], 0  ;;  %s683_s12 = smov 0   ;;  %s685_s13 = smov 0  }
   0x2   :  { %s687_s14 = smov 0   ;;  %s689_s15 = smov 0  }
   0x3 LB: > { %s704_s16 = sadd.s32 4294967295, %s655_s15   ;;  %s503_s17 = sadd.s32 4294967294, %s655_s15   ;;  %s655_s15 = sphi %s689_s15, %s818_s15   ;;  %s651_s14 = sphi %s687_s14, %s817_s14   ;;  %s647_s13 = sphi %s685_s13, %s816_s13   ;;  %s643_s12 = sphi %s683_s12, %s815_s12  }
   0x4   : > { %s708_s18 = sadd.s32 1, %s655_s15   ;;  %s91_s19 = sadd.s32 1, %s651_s14 }
   0x5   : > { %s88_s20 = ssub.s32 %s655_s15, %s708_s18  ;;  %p101_p0 = scmp.ne.s32.totalorder %s651_s14, %s647_s13 }
   0x6   : > { %p89_p1 = scmp.eq.s32.totalorder %s88_s20, 0  ;;  %p102_p2 = scmp.eq.s32.totalorder %s704_s16, 1 }
   0x7   : > { %p107_p3 = scmp.ne.s32.totalorder %s647_s13, %s643_s12  ;;  %p108_p4 = scmp.eq.s32.totalorder %s503_s17, 1 }
   0x8   : > { %s719_s21 = scalar_select %p89_p1, %s651_s14, %s91_s19  }
   0x9   : > { %p721_p5 = por %p102_p2, %p101_p0  ;;  %p725_p6 = por %p108_p4, %p107_p3 }
   0xa   : > { %p506_p7 = scmp.ge.s32.totalorder %s655_s15, 1  ;;  %p140_p8 = scmp.lt.s32.totalorder %s655_s15, 3 }
   0xc   : > { %p141_p9 = pnand %p506_p7, %p140_p8 }
   0xd   : > { %p164_p10 = scmp.lt.s32.totalorder (!%p141_p9), %s704_s16, 1  ;;  %v657_v0 = vmov (!%p141_p9), 0.0   ;;  %v180_v1 = vld [vmem:[%s809_s2] sm:$0xff] (!%p141_p9)  ;;  %v658_v2 = vmov (!%p141_p9), 0   ;;  %vm190_vm0 = vcmask (!%p141_p9), 1040384   ;;  %vm659_vm1 = vmmov (!%p141_p9), 1  }
   0xe   : > { %144 = sbr.rel (%p141_p9) target bundleno = 267 (0x10b), region = 32  ;;  %270 = vmatprep.mubr.f32.mxu0 (!%p141_p9), %v657_v0  ;;  %341 = vmatprep.mubr.f32.mxu1 (!%p141_p9), %v657_v0  ;;  %vm739_vm2 = vmpackc.low (!%p141_p9), %vm190_vm0, %vm659_vm1  ;;  %v169_v18 = vld [vmem:[%s808_s1] sm:$0xff] (!%p141_p9)  ;;  %vm186_vm3 = vcmask (!%p141_p9), 72704   ;;  %v660_v20 = vmov (!%p141_p9), 0.0|0.0   ;;  %vm661_vm4 = vmmov (!%p141_p9), 0   ;;  %s161_s6 = sand.u32 (!%p141_p9), 1, %s647_s13  }
   0xf   : > { %592 = vset.pattern.permute.xlu0 (!%p141_p9), %v658_v2  ;;  %s545_s7 = smul.u32 (!%p141_p9), 40, %s161_s6  ;;  %vm427_vm5 = vcmask (!%p141_p9), 523264   ;;  %s430_s19 = scalar_lea.sflag (!%p141_p9), [#allocation3], %s161_s6 }
  0x10   : > { %183 = vperm.xlu0 (!%p141_p9), %592, %v180_v1   ;;  %s547_s8 = smul.u32 (!%p141_p9), 640, %s704_s16  ;;  %s662_s24 = smov (!%p141_p9), [#allocation2]  }
  0x11   : > { %s163_s9 = scalar_lea.vmem (!%p141_p9), [#allocation2], %s545_s7  ;;  %s597_s25 = sshll.u32 (!%p141_p9), %s662_s24, 4  ;;  %s598_s25 = int_to_ptr.vmem [resolvable:$false] %s597_s25 }
  0x12   : > { %s444_s10 = sshll.u32 (!%p141_p9), %s163_s9, 4  ;;  %s765_s10 = int_to_ptr.vmem [resolvable:$true] %s444_s10 }
  0x13   : > { %s593_s20 = scalar_lea.vmem (!%p141_p9), %s765_s10, 640  ;;  %p600_p0 = scmp.lt.s32.totalorder (!%p141_p9), %s765_s10, %s598_s25 }
  0x14   : > { %p594_p11 = scmp.ne.s32.totalorder (!%p141_p9), %s765_s10, %s593_s20 }
  0x15   : > { %s165_s26 = scalar_select %p164_p10, %s704_s16, 1 }
  0x16   : > { %s763_s16 = scalar_lea.hbm %s810_s3, %s547_s8  ;;  %p595_p12 = pnand %p594_p11, %p721_p5 }
  0x17   : > { %s546_s27 = smul.u32 80, %s165_s26  ;;  %s599_s26 = scalar_lea.vmem %s598_s25, 1280 }
  0x18   : > { %p596_p13 = pneg %p595_p12  ;;  %p601_p1 = scmp.lt.s32.totalorder %s599_s26, %s593_s20 }
  0x19   : > { %s168_s30 = scalar_lea.vmem %s807_s0, %s546_s27 }
  0x1a   : > { %v171_v4 = vld [vmem:[%s168_s30 + $0x8] sm:$0xff]  ;;  %v176_v5 = vld [vmem:[%s168_s30 + $0x30] sm:$0x1]  ;;  %v170_v6 = vld [vmem:[%s168_s30] sm:$0xff]  ;;  %p602_p2 = por %p601_p1, %p600_p0 }
  0x1b   : > { %v529_v7 = vpack.c.bf16 %v176_v5, %v171_v4  ;;  %v175_v8 = vld [vmem:[%s168_s30 + $0x28] sm:$0x1]  ;;  %v173_v9 = vld [vmem:[%s168_s30 + $0x18] sm:$0xff]  ;;  %v178_v10 = vld [vmem:[%s168_s30 + $0x40] sm:$0x1] }
  0x1c   : > { %v532_v11 = vpack.c.bf16 %v175_v8, %v170_v6  ;;  %v535_v12 = vpack.c.bf16 %v178_v10, %v173_v9  ;;  %v172_v13 = vld [vmem:[%s168_s30 + $0x10] sm:$0xff]  ;;  %v177_v14 = vld [vmem:[%s168_s30 + $0x38] sm:$0x1]  ;;  %v174_v15 = vld [vmem:[%s168_s30 + $0x20] sm:$0xff]  ;;  %p603_p3 = pnand %p602_p2, %p596_p13 }
  0x1d   : > { %531 = vmatprep.subr.msk.bf16.mxu0 %vm739_vm2, %v529_v7  ;;  %v538_v16 = vpack.c.bf16 %v177_v14, %v172_v13  ;;  %v179_v17 = vld [vmem:[%s168_s30 + $0x48] sm:$0x1] }
  0x1e   : > { %534 = vmatpush1.bf16.msk.msra.mxu0 %vm739_vm2, %v532_v11  ;;  %537 = vmatprep.subr.msk.bf16.mxu1 %vm739_vm2, %v535_v12  ;;  %v542_v19 = vpack.c.bf16 %v179_v17, %v174_v15 }
  0x1f   : > { %540 = vmatpush1.bf16.msk.msra.mxu1 %vm739_vm2, %v538_v16  ;;  %541 = vmatprep.subr.bf16.mxu0 %v660_v20 }
  0x21   : > { %510 = vmatmul.mubr.msk.f32.vlgmr.msra.gmra.mrb[0].mxu0 %vm186_vm3, %v169_v18 }
  0x22   : > { %544 = vmatpush3.bf16.msk.msra.mxu0 %vm739_vm2, %v542_v19  ;;  %513 = vmatmul.mubr.msk.f32.vlgmr.msra.gmra.mrb[0].mxu1 %vm186_vm3, %v169_v18 }
  0x23   : > { %526 = vmatprep.mubr.msk.f32.mxu0 %vm661_vm4, %v657_v0 }
  0x25   : > { %527 = vmatmul.mubr.msk.f32.vlgmr.msra.gmra.mrb[2].mxu0 %vm186_vm3, %v169_v18 }
  0x8f   : > { %v184_v21 = vpop.permute.xlu0 %183 }
  0xf4   : > { %v272_v22 = vpop.f32.mrb[0].mxu0 }
  0xf5   : > { %v273_v23 = vadd.f32 %v272_v22, %v184_v21  ;;  %v274_v24 = vpop.f32.mrb[1].mxu0  ;;  %v343_v25 = vpop.f32.mrb[0].mxu1 }
  0xf6   : > { %v275_v26 = vadd.f32 %v274_v24, %v184_v21  ;;  %v344_v27 = vadd.f32 %v343_v25, %v184_v21  ;;  %v345_v28 = vpop.f32.mrb[1].mxu1 }
  0xf7   : > { %v418_v29 = vmax.f32 %v273_v23, 0.0  ;;  %v346_v30 = vadd.f32 %v345_v28, %v184_v21 }
  0xf8   : > { %v419_v31 = vmax.f32 %v275_v26, 0.0  ;;  %v420_v32 = vmax.f32 %v344_v27, 0.0  ;;  %v414_v33 = vpop.f32.mrb[2].mxu0 }
  0xf9   : > { %423 = vst [vmem:[%s163_s9] sm:$0xff] %v418_v29  ;;  %v421_v34 = vmax.f32 %v346_v30, 0.0  ;;  %v415_v35 = vadd.f32 %v414_v33, %v184_v21  ;;  %v528_v36 = vpop.f32.mrb[3].mxu0 }
  0xfa   : > { %424 = vst [vmem:[%s163_s9 + $0x8] sm:$0xff] %v419_v31  ;;  %425 = vst [vmem:[%s163_s9 + $0x10] sm:$0xff] %v420_v32 }
  0xfb   : > { %426 = vst [vmem:[%s163_s9 + $0x18] sm:$0xff] %v421_v34  ;;  %v422_v37 = vmax.f32 %v415_v35, 0.0 }
  0xfd   : > { %428 = vst.msk [vmem:[%s163_s9 + $0x20] sm:$0xff] %vm427_vm5, %v422_v37 }
  0xfe   : > { %606 = shalt.err (!%p603_p3)
}
  0xff   : > { %s607_s27 = scalar_lea.hbm %s763_s16, 640  ;;  %s611_s30 = scalar_lea.hbm %s810_s3, 1280 }
 0x100   : > { %p608_p4 = scmp.ne.s32.totalorder %s763_s16, %s607_s27  ;;  %p612_p9 = scmp.lt.u32.totalorder %s763_s16, %s810_s3 }
 0x101   : > { %p613_p10 = scmp.lt.u32.totalorder %s611_s30, %s607_s27  ;;  %p615_p12 = scmp.lt.u32.totalorder %s607_s27, %s763_s16 }
 0x102   : > { %p609_p7 = pnand %p608_p4, %p721_p5 }
 0x103   : > { %p614_p11 = por %p613_p10, %p612_p9 }
 0x104   : > { %p610_p8 = pneg %p609_p7 }
 0x105   : > { %p616_p13 = por %p615_p12, %p614_p11 }
 0x107   : > { %p617_p0 = pnand %p616_p13, %p610_p8 }
 0x109   : > { %620 = shalt.err (!%p617_p0)
}
 0x10a   : > { %548 = dma.vmem_to_hbm [thread:$0]  (%p721_p5), %s765_s10, 640, %s763_s16, %s430_s19  }
 0x10b PF: > { %p554_p1 = scmp.ge.s32.totalorder %s655_s15, 2  ;;  %s456_s6 = sand.u32 1, %s643_s12  }
 0x10c   : > { %s457_s7 = scalar_lea.sflag [#allocation3], %s456_s6 }
 0x10d   : > { %p551_p2 = pnand %p554_p1, %p725_p6 }
 0x10f   : > { %638 = dma.done.wait (!%p551_p2), %s457_s7, 640  }
 0x110   : > { %640 = vsyncadd (!%p551_p2), %s457_s7, 4294966656  ;;  %p13_p3 = scmp.ge.s32.totalorder %s708_s18, 4   ;;  %s815_s12 = smov %s647_s13 }
 0x111   : > { %s816_s13 = smov %s651_s14  ;;  %s817_s14 = smov %s719_s21 }
 0x112   : > { %s818_s15 = smov %s708_s18  ;;  %15 = sbr.rel (!%p13_p3) target bundleno = 3 (0x3), region = 67 }
 0x119   :  { %462 = vsyncpa [#allocation3], 1 }
 0x11a   :  { %464 = vsyncpa [#allocation3 + $0x1], 1 }

</bundles_post_ra>
